<compile_context>
chip_gen: v5e
topology: v5e:2x2
jax: 0.10.0
libtpu: 0.0.40
codegen_flags: <defaults>
</compile_context>

<pallas_src>
import numpy as np
import jax
import jax.numpy as jnp
from jax.experimental import pallas as pl
from jax.experimental.pallas import tpu as pltpu


def _posenc_add_kernel(x_ref, pe_ref, o_ref):
    # x_ref / o_ref: (TS, D) tile of one batch element (batch dim squeezed away).
    # pe_ref:        (TS, D) tile shared across the batch; its block index does
    #                not depend on the inner (batch) grid axis, so Pallas keeps
    #                it resident instead of re-fetching it every inner step.
    o_ref[...] = x_ref[...] + pe_ref[...]


def make_positional_encoding(d_model, max_len=5000, dtype=jnp.float32):
    """Replicates the torch buffer construction deterministically."""
    assert d_model % 2 == 0, "d_model must be even (same constraint as the torch snippet)"
    position = jnp.arange(0, max_len, dtype=jnp.float32)[:, None]              # (L, 1)
    div_term = jnp.exp(
        jnp.arange(0, d_model, 2, dtype=jnp.float32) * (-np.log(10000.0) / d_model)
    )                                                                           # (D/2,)
    pe = jnp.zeros((max_len, d_model), dtype=jnp.float32)
    pe = pe.at[:, 0::2].set(jnp.sin(position * div_term))
    pe = pe.at[:, 1::2].set(jnp.cos(position * div_term))
    return pe.astype(dtype)                                                     # (L, D)


def _choose_seq_tile(S, D, itemsize, block_bytes=1 << 20):
    """Largest seq tile keeping one (TS, D) block under ~block_bytes while
    respecting the TPU sublane multiple for the dtype (8 f32 / 16 bf16 / 32 i8).
    ~1 MiB blocks already sit near the HBM roofline for streaming adds while
    leaving plenty of double-buffering headroom on all generations."""
    sub = max(8, 32 // max(1, itemsize))
    ts = (block_bytes // max(1, D * itemsize)) // sub * sub
    ts = max(sub, ts)
    if ts >= S:
        return S  # full-extent block along S is always a legal block shape
    return ts


def positional_encoding_forward(x, pe, *, block_bytes=1 << 20):
    """x: (B, S, D); pe: (max_len, D). Returns x + pe[:S] via a Pallas kernel."""
    B, S, D = x.shape
    # Glue (mirrors self.pe[:, :x.size(1)]): static slice + dtype match so the
    # in-kernel add never promotes and the aliased store dtype is well-defined.
    pe_slice = pe[:S].astype(x.dtype)

    ts = _choose_seq_tile(S, D, jnp.dtype(x.dtype).itemsize, block_bytes)
    # Batch innermost -> the pe tile stays resident across all B inner iterations.
    # A ragged last seq tile (S % ts != 0) is handled by Pallas edge padding /
    # masked stores, which is safe for this elementwise add.
    grid = (pl.cdiv(S, ts), B)

    return pl.pallas_call(
        _posenc_add_kernel,
        out_shape=jax.ShapeDtypeStruct((B, S, D), x.dtype),
        grid_spec=pltpu.PrefetchScalarGridSpec(
            num_scalar_prefetch=0,
            grid=grid,
            in_specs=[
                # Batch dim squeezed out of the kernel view -> broadcast-free 2-D add.
                pl.BlockSpec((pl.Squeezed(), ts, D), lambda s, b: (b, s, 0)),
                # pe block index depends only on the seq tile -> reused over batch.
                pl.BlockSpec((ts, D), lambda s, b: (s, 0)),
            ],
            out_specs=pl.BlockSpec((pl.Squeezed(), ts, D), lambda s, b: (b, s, 0)),
        ),
        # In-place x + pe: alias x (input 0) with the output; saves a full B*S*D
        # HBM allocation for this purely bandwidth-bound kernel.
        input_output_aliases={0: 0},
        compiler_params=pltpu.CompilerParams(
            dimension_semantics=("parallel", "parallel"),
            vmem_limit_bytes=32 * 1024 * 1024,
        ),
    )(x, pe_slice)


if __name__ == "__main__":
    # Small demo shapes consistent with the module; d_model kept a multiple of 128
    # so output stores are lane-dense (unmasked vst).
    batch, seq, d_model = 2, 8, 128
    max_len = 5000

    key = jax.random.PRNGKey(0)
    x = jax.random.normal(key, (batch, seq, d_model), dtype=jnp.float32)

    pe = make_positional_encoding(d_model, max_len=max_len)

    # Reference (pure-JAX semantics of the torch forward), computed and
    # materialized before the aliased kernel call so x's values are consumed.
    ref = x + pe[:seq][None, :, :]
    ref = jax.block_until_ready(ref)

    out = positional_encoding_forward(x, pe)
    out = jax.block_until_ready(out)

    np.testing.assert_allclose(np.asarray(out), np.asarray(ref), rtol=1e-6, atol=1e-6)
    print("KERNEL_OK")
</pallas_src>

<mosaic_0001>
module attributes {stable_mosaic.version = 11 : i64} {
  func.func @_posenc_add_kernel(%arg0: i32, %arg1: i32, %arg2: memref<1x8x128xf32, #tpu.memory_space<vmem>>, %arg3: memref<8x128xf32, #tpu.memory_space<vmem>>, %arg4: memref<1x8x128xf32, #tpu.memory_space<vmem>>) attributes {dimension_semantics = [#tpu.dimension_semantics<parallel>, #tpu.dimension_semantics<parallel>], iteration_bounds = array<i64: 1, 2>, scalar_prefetch = 0 : i64, scratch_operands = 0 : i64, tpu.core_type = #tpu.core_type<tc>, window_params = [{transform_indices = @transform_0, window_bounds = array<i64: 1, 8, 128>}, {transform_indices = @transform_1, window_bounds = array<i64: 8, 128>}, {transform_indices = @transform_2, window_bounds = array<i64: 1, 8, 128>}]} {
    %c0 = arith.constant 0 : index
    %c0_0 = arith.constant 0 : index
    %c0_1 = arith.constant 0 : index
    %0 = vector.load %arg2[%c0, %c0_0, %c0_1] : memref<1x8x128xf32, #tpu.memory_space<vmem>>, vector<1x8x128xf32>
    %1 = vector.shape_cast %0 : vector<1x8x128xf32> to vector<8x128xf32>
    %c0_2 = arith.constant 0 : index
    %c0_3 = arith.constant 0 : index
    %2 = vector.load %arg3[%c0_2, %c0_3] : memref<8x128xf32, #tpu.memory_space<vmem>>, vector<8x128xf32>
    %3 = arith.addf %1, %2 : vector<8x128xf32>
    %c0_4 = arith.constant 0 : index
    %c0_5 = arith.constant 0 : index
    %c0_6 = arith.constant 0 : index
    %4 = vector.load %arg4[%c0_4, %c0_5, %c0_6] : memref<1x8x128xf32, #tpu.memory_space<vmem>>, vector<1x8x128xf32>
    %5 = vector.shape_cast %4 : vector<1x8x128xf32> to vector<8x128xf32>
    %6 = vector.shape_cast %3 : vector<8x128xf32> to vector<1x8x128xf32>
    tpu.vector_store %arg4[%c0_4, %c0_5, %c0_6], %6 {strides = array<i32>} : memref<1x8x128xf32, #tpu.memory_space<vmem>>, vector<1x8x128xf32>,
    return
  }
  func.func @transform_0(%arg0: i32, %arg1: i32) -> (i32, i32, i32) {
    %c0_i32 = arith.constant 0 : i32
    %c0_i32_0 = arith.constant 0 : i32
    return %arg1, %arg0, %c0_i32 : i32, i32, i32
  }
  func.func @transform_1(%arg0: i32, %arg1: i32) -> (i32, i32) {
    %c0_i32 = arith.constant 0 : i32
    %c0_i32_0 = arith.constant 0 : i32
    return %arg0, %c0_i32 : i32, i32
  }
  func.func @transform_2(%arg0: i32, %arg1: i32) -> (i32, i32, i32) {
    %c0_i32 = arith.constant 0 : i32
    %c0_i32_0 = arith.constant 0 : i32
    return %arg1, %arg0, %c0_i32 : i32, i32, i32
  }
}

</mosaic_0001>

<bundles_post_ra>
// kernel: tpu_custom_call.1
= control target key start
LH: loop header
LB: loop body
LE: loop exit
PB: predicated region body
PF: predicated region fallthrough
CT: control target
= control target key end

     0   :  { %7 = vsyncpa [#allocation3], 0  ;;  %s639_s0 = inlined_call_operand.hbm [shape: f32[2,8,128], index: 0, kind: input, shape index: {}, may-alias: {0,2}]   ;;  %s640_s1 = inlined_call_operand.vmem [shape: f32[8,128], index: 1, kind: input, shape index: {}]   ;;  %s641_s2 = inlined_call_operand.hbm [shape: f32[2,8,128], index: 2, kind: output, shape index: {}, may-alias: {0,2}]  }
   0x1   :  { %9 = vsyncpa [#allocation3 + $0x1], 0 }
   0x2   :  { %10 = vsyncpa [#allocation4], 0 }
   0x3   :  { %12 = vsyncpa [#allocation4 + $0x1], 0  ;;  %s516_s9 = smov 0   ;;  %s518_s10 = smov 0  }
   0x4   :  { %s520_s11 = smov 0   ;;  %s522_s12 = smov 0  }
   0x5   :  { %s524_s13 = smov 0   ;;  %s526_s14 = smov 0  }
   0x6 LB: > { %s311_s15 = sadd.s32 4294967295, %s499_s14   ;;  %s312_s16 = sadd.s32 4294967294, %s499_s14   ;;  %s499_s14 = sphi %s526_s14, %s18_s14   ;;  %s495_s13 = sphi %s524_s13, %s650_s13   ;;  %s491_s12 = sphi %s522_s12, %s649_s12   ;;  %s487_s11 = sphi %s520_s11, %s648_s11   ;;  %s483_s10 = sphi %s518_s10, %s647_s10   ;;  %s479_s9 = sphi %s516_s9, %s646_s9  }
   0x7   : > { %s27_s17 = sadd.s32 1, %s495_s13  ;;  %s39_s18 = sadd.s32 1, %s487_s11 }
   0x8   : > { %p28_p0 = scmp.ge.s32.totalorder %s27_s17, 2  ;;  %p46_p1 = scmp.ne.s32.totalorder %s487_s11, %s483_s10 }
   0x9   : > { %p47_p2 = scmp.eq.s32.totalorder %s499_s14, 0  ;;  %p52_p3 = scmp.ne.s32.totalorder %s483_s10, %s479_s9 }
   0xa   : > { %s652_s17 = smov (%p28_p0, %s27_s17), 0  ;;  %p53_p5 = scmp.eq.s32.totalorder %s311_s15, 0 }
   0xb   : > { %p557_p4 = por %p47_p2, %p46_p1  ;;  %s34_s20 = ssub.s32 %s495_s13, %s652_s17 }
   0xc   : > { %p104_p6 = scmp.eq.s32.totalorder %s311_s15, 1  ;;  %p37_p7 = scmp.eq.s32.totalorder %s34_s20, 0 }
   0xd   : > { %p563_p8 = por %p53_p5, %p52_p3  ;;  %p110_p10 = scmp.eq.s32.totalorder %s312_s16, 1 }
   0xe   : > { %p567_p9 = por %p104_p6, %p46_p1  ;;  %p315_p12 = scmp.ge.s32.totalorder %s499_s14, 2 }
   0xf   : > { %s572_s23 = scalar_select %p37_p7, %s487_s11, %s39_s18  }
  0x10   : > { %p574_p11 = por %p110_p10, %p52_p3  ;;  %p337_p13 = scmp.lt.s32.totalorder %s499_s14, 2 }
  0x11   : > { %s137_s25 = sand.u32 1, %s487_s11   ;;  %s317_s27 = sshll.u32 %s495_s13, 3 }
  0x12   : > { %s316_s26 = sshll.u32 %s137_s25, 3  ;;  %s146_s30 = scalar_lea.hbm %s639_s0, %s317_s27 }
  0x13   : > { %s141_s3 = scalar_lea.vmem [#allocation2], %s316_s26  ;;  %s148_s5 = sshll.u32 %s146_s30, 4  ;;  %s149_s5 = int_to_ptr.hbm [resolvable:$true] %s148_s5 }
  0x14   : > { %s150_s4 = sshll.u32 %s141_s3, 4  ;;  %p330_p0 = pnand %p337_p13, %p557_p4  ;;  %s151_s4 = int_to_ptr.vmem [resolvable:$true] %s150_s4 }
  0x15   : > { %p318_p1 = scmp.ge.s32.totalorder %s499_s14, 1  ;;  %p155_p2 = scmp.lt.s32.totalorder %s499_s14, 3 }
  0x16   : > { %s138_s6 = scalar_lea.sflag [#allocation3], %s137_s25 }
  0x17   : > { %332 = dma.hbm_to_vmem [thread:$0]  (!%p330_p0), %s149_s5, 128, %s151_s4, %s138_s6  }
  0x18   : > { %p156_p3 = pnand %p318_p1, %p155_p2 }
  0x19   : > { %s590_s7 = sand.u32 (!%p156_p3), 1, %s483_s10  }
  0x1a   : > { %159 = sbr.rel (%p156_p3) target bundleno = 47 (0x2f), region = 28  ;;  %s319_s8 = sshll.u32 (!%p156_p3), %s590_s7, 3 }
  0x1b   : > { %s162_s15 = scalar_lea.sflag (!%p156_p3), [#allocation3], %s590_s7  ;;  %s165_s16 = scalar_lea.vmem (!%p156_p3), [#allocation2], %s319_s8 }
  0x1f   : > { %470 = dma.done.wait (%p563_p8), %s162_s15, 128  }
  0x20   : > { %472 = vsyncadd (%p563_p8), %s162_s15, 4294967168  ;;  %s322_s18 = sshll.u32 %s491_s12, 3  ;;  %s190_s26 = scalar_lea.vmem [#allocation5], %s319_s8  ;;  %v195_v0 = vld [vmem:[%s165_s16] sm:$0xff] }
  0x21   : > { %s211_s25 = scalar_lea.hbm %s641_s2, %s322_s18  ;;  %s213_s27 = sshll.u32 %s190_s26, 4  ;;  %v196_v1 = vld [vmem:[%s640_s1] sm:$0xff]  ;;  %s214_s27 = int_to_ptr.vmem [resolvable:$true] %s213_s27 }
  0x22   : > { %s215_s28 = sshll.u32 %s211_s25, 4  ;;  %v197_v2 = vadd.f32 %v196_v1, %v195_v0  ;;  %s200_s21 = scalar_lea.sflag [#allocation4], %s590_s7  ;;  %s216_s28 = int_to_ptr.hbm [resolvable:$true] %s215_s28 }
  0x23   : > { %s431_s3 = sshra.s32 %s216_s28, 4  ;;  %s437_s6 = scalar_lea.hbm %s641_s2, 16  ;;  %s432_s3 = int_to_ptr.hbm [resolvable:$true] %s431_s3 }
  0x24   : > { %198 = vst [vmem:[%s190_s26] sm:$0xff] %v197_v2  ;;  %s433_s12 = scalar_lea.hbm %s432_s3, 8  ;;  %p438_p7 = scmp.lt.s32.totalorder %s432_s3, %s641_s2 }
  0x25   : > { %p434_p4 = scmp.ne.s32.totalorder %s432_s3, %s433_s12  ;;  %p439_p8 = scmp.lt.s32.totalorder %s437_s6, %s433_s12 }
  0x27   : > { %p435_p5 = pnand %p434_p4, %p567_p9  ;;  %p440_p10 = por %p439_p8, %p438_p7 }
  0x29   : > { %p436_p6 = pneg %p435_p5 }
  0x2b   : > { %p441_p13 = pnand %p440_p10, %p436_p6 }
  0x2d   : > { %444 = shalt.err (!%p441_p13)
}
  0x2e   : > { %327 = dma.vmem_to_hbm [thread:$0]  (%p567_p9), %s214_s27, 128, %s216_s28, %s200_s21  }
  0x2f PF: > { %s227_s7 = sand.u32 1, %s479_s9   ;;  %p334_p0 = pnand %p315_p12, %p574_p11 }
  0x30   : > { %s228_s16 = scalar_lea.sflag [#allocation4], %s227_s7 }
  0x31   : > { %p335_p1 = pneg %p334_p0 }
  0x33   : > { %474 = dma.done.wait (%p335_p1), %s228_s16, 128  }
  0x34   : > { %476 = vsyncadd (%p335_p1), %s228_s16, 4294967168  ;;  %s18_s14 = sadd.s32 1, %s499_s14   ;;  %s646_s9 = smov %s483_s10 }
  0x35   : > { %p15_p2 = scmp.ge.s32.totalorder %s18_s14, 4   ;;  %s647_s10 = smov %s487_s11 }
  0x36   : > { %s648_s11 = smov %s572_s23  ;;  %s649_s12 = smov %s495_s13 }
  0x37   : > { %s650_s13 = smov %s652_s17  ;;  %17 = sbr.rel (!%p15_p2) target bundleno = 6 (0x6), region = 76 }
  0x3c   :  { %234 = vsyncpa [#allocation3], 1 }
  0x3d   :  { %236 = vsyncpa [#allocation3 + $0x1], 1 }
  0x3e   :  { %237 = vsyncpa [#allocation4], 1 }
  0x3f   :  { %239 = vsyncpa [#allocation4 + $0x1], 1 }

</bundles_post_ra>
